<compile_context>
chip_gen: v5e
topology: v5e:2x2
jax: 0.10.0
libtpu: 0.0.40
codegen_flags: <defaults>
</compile_context>

<pallas_src>
import jax
import jax.numpy as jnp
from jax import lax
from jax.experimental import pallas as pl
from jax.experimental.pallas import tpu as pltpu

# int8 target dtype
QMIN = -128.0
QMAX = 127.0
EPS = float(jnp.finfo(jnp.float32).eps)


# ----------------------------------------------------------------------------
# Tile selection (byte-budget based, no divisor collapse)
# ----------------------------------------------------------------------------
def _pick_tiles(N, C, L, itemsize, acc_itemsize,
                tile_budget=2 * 1024 * 1024, acc_budget=32 * 1024):
    # Sublane granularity by element width (layout-friendly channel blocks).
    sub = {4: 8, 2: 16, 1: 32}.get(itemsize, 8)

    # ---- lane tile: multiple of 128 (or full L when L < 128), sized by byte budget ----
    if L <= 128:
        lane_tile = L
    else:
        lane_cap = max(128, (tile_budget // (sub * itemsize)) // 128 * 128)
        lane_tile = min(((L + 127) // 128) * 128, lane_cap)
    n_lane = -(-L // lane_tile)
    need_mask = (n_lane * lane_tile != L)

    # ---- channel block: grow toward the budget when H*W is small, but keep >= 2
    # channel blocks when possible so v7x's two TensorCores both get work ----
    if C <= sub:
        cb = C                                   # full extent (always legal)
    else:
        cb = sub
        while (cb * 2 <= 64
               and cb * 2 * lane_tile * itemsize <= tile_budget
               and -(-C // (cb * 2)) >= 2):
            cb *= 2

    # ---- batch block: fold several batch slices per grid step when tiles are still
    # small. nb must divide N exactly (a ragged batch block would contaminate the
    # per-channel reduction), and is capped to keep the traced loop small ----
    nb = 1
    step_bytes = cb * lane_tile * itemsize
    max_nb = max(1, min(N, 32, tile_budget // max(1, step_bytes)))
    for cand in range(max_nb, 0, -1):
        if N % cand == 0:
            nb = cand
            break

    # ---- in-register accumulator strips: 2 independent (min,max) pairs when the
    # register footprint allows (ILP), ~8-16 vregs of accumulators max ----
    ilp = 2 if cb <= 16 else 1
    if lane_tile % 128 != 0:
        strip_w = lane_tile                      # tiny / odd full-extent lane tile
    else:
        strip_w = 128
        for cand in (512, 256):
            if lane_tile % cand == 0 and 2 * ilp * cb * cand * acc_itemsize <= acc_budget:
                strip_w = cand
                break
    return nb, cb, lane_tile, n_lane, need_mask, strip_w, ilp


# ----------------------------------------------------------------------------
# Fused kernel: streaming per-channel min/max + running-state fold + qparams
# ----------------------------------------------------------------------------
def _make_observer_kernel(*, nb, cb, lane_tile, strip_w, ilp, L, acc_dtype, need_mask):
    n_strips = lane_tile // strip_w
    ilp = max(1, min(ilp, n_strips))
    n_groups = n_strips // ilp
    rem = n_strips - n_groups * ilp
    pos_inf = float("inf")
    neg_inf = float("-inf")

    def kernel(x_ref, prev_min_ref, prev_max_ref,
               min_ref, max_ref, scale_ref, zp_ref,
               acc_min_ref, acc_max_ref):
        n_id = pl.program_id(1)
        j_id = pl.program_id(2)
        first = jnp.logical_and(n_id == 0, j_id == 0)
        last = jnp.logical_and(n_id == pl.num_programs(1) - 1,
                               j_id == pl.num_programs(2) - 1)

        if need_mask:
            # Hoisted out of the strip loop (JAX does not CSE broadcasts).
            lane_iota = lax.broadcasted_iota(jnp.int32, (cb, strip_w), 1)
            lane_base = j_id * lane_tile

        def load_strip(b, off):
            if n_strips == 1:
                a = x_ref[b]                                 # whole (cb, lane_tile) slab
            else:
                if not isinstance(off, int):
                    off = pl.multiple_of(off, strip_w)
                a = x_ref[b, :, pl.ds(off, strip_w)]
            a = a.astype(acc_dtype)
            if need_mask:
                valid = (lane_iota + (lane_base + off)) < L
                return jnp.where(valid, a, pos_inf), jnp.where(valid, a, neg_inf)
            return a, a

        # Register-carried (min, max) accumulator pairs (ILP across strips).
        mins = [jnp.full((cb, strip_w), pos_inf, acc_dtype) for _ in range(ilp)]
        maxs = [jnp.full((cb, strip_w), neg_inf, acc_dtype) for _ in range(ilp)]

        for b in range(nb):                                   # static batch-slice loop
            if n_groups > 0:
                def body(g, carry, b=b):
                    ms, xs = carry
                    ms, xs = list(ms), list(xs)
                    base = g * (ilp * strip_w)
                    for k in range(ilp):
                        lo, hi = load_strip(b, base + k * strip_w)
                        ms[k] = jnp.minimum(ms[k], lo)
                        xs[k] = jnp.maximum(xs[k], hi)
                    return tuple(ms), tuple(xs)

                ms, xs = lax.fori_loop(0, n_groups, body,
                                       (tuple(mins), tuple(maxs)),
                                       unroll=min(4, n_groups))
                mins, maxs = list(ms), list(xs)
            for k in range(rem):                              # static tail strips
                lo, hi = load_strip(b, (n_groups * ilp + k) * strip_w)
                mins[k % ilp] = jnp.minimum(mins[k % ilp], lo)
                maxs[k % ilp] = jnp.maximum(maxs[k % ilp], hi)

        mn_t = mins[0]
        mx_t = maxs[0]
        for k in range(1, ilp):
            mn_t = jnp.minimum(mn_t, mins[k])
            mx_t = jnp.maximum(mx_t, maxs[k])

        # One VMEM RMW per grid step; the scratch accumulator persists across the
        # batch and lane grid axes for the current channel block.
        @pl.when(first)
        def _():
            acc_min_ref[...] = mn_t
            acc_max_ref[...] = mx_t

        @pl.when(jnp.logical_not(first))
        def _():
            acc_min_ref[...] = jnp.minimum(acc_min_ref[...], mn_t)
            acc_max_ref[...] = jnp.maximum(acc_max_ref[...], mx_t)

        # Finalize once per channel block: single cross-lane (XLU) reduce, fold with the
        # prior observer state, then qparams (asymmetric int8, preserve_zero, INT domain).
        # NOTE: NaNs propagate through min/max like torch.aminmax.
        @pl.when(last)
        def _():
            mn = jnp.min(acc_min_ref[...], axis=-1, keepdims=True).astype(jnp.float32)
            mx = jnp.max(acc_max_ref[...], axis=-1, keepdims=True).astype(jnp.float32)
            mn = jnp.minimum(mn, prev_min_ref[...])
            mx = jnp.maximum(mx, prev_max_ref[...])
            min_ref[...] = mn
            max_ref[...] = mx

            mn0 = jnp.minimum(mn, 0.0)                       # preserve_zero=True
            mx0 = jnp.maximum(mx, 0.0)
            scale = jnp.maximum((mx0 - mn0) / (QMAX - QMIN), EPS)
            # True divide so rounding matches the reference exactly.
            zp = jnp.clip(QMIN - jnp.round(mn0 / scale), QMIN, QMAX)
            scale_ref[...] = scale
            zp_ref[...] = zp.astype(jnp.int32)

    return kernel


# ----------------------------------------------------------------------------
# Wrapper (forward + calculate_qparams fused)
# ----------------------------------------------------------------------------
def affine_observer_forward(x_nchw, prev_min, prev_max, tile_budget_bytes=2 * 1024 * 1024):
    """Per-axis (axis=1, i.e. per-channel) min/max affine observer on an NCHW tensor.

    Returns (x_unchanged, min_val[C], max_val[C], scale[C], zero_point[C]).
    """
    N, C, H, W = x_nchw.shape
    L = H * W

    x_dtype = x_nchw.dtype
    itemsize = jnp.dtype(x_dtype).itemsize
    # min/max is pure selection -> accumulate in the native dtype for f32/bf16 (halves
    # VALU + vreg traffic per HBM byte on v6e/v7x); widen other dtypes to f32.
    if x_dtype == jnp.float32 or x_dtype == jnp.bfloat16:
        acc_dtype = x_dtype
    else:
        acc_dtype = jnp.float32
    acc_itemsize = jnp.dtype(acc_dtype).itemsize

    nb, cb, lane_tile, n_lane, need_mask, strip_w, ilp = _pick_tiles(
        N, C, L, itemsize, acc_itemsize, tile_budget=tile_budget_bytes)
    n_cblk = -(-C // cb)

    # Free contiguous view (no transpose, no extra HBM copy).
    x3d = x_nchw.reshape(N, C, L)
    prev_min2d = prev_min.reshape(C, 1).astype(jnp.float32)
    prev_max2d = prev_max.reshape(C, 1).astype(jnp.float32)

    kernel = _make_observer_kernel(nb=nb, cb=cb, lane_tile=lane_tile, strip_w=strip_w,
                                   ilp=ilp, L=L, acc_dtype=acc_dtype, need_mask=need_mask)

    ch_spec = pl.BlockSpec((cb, 1), lambda i, n, j: (i, 0))

    min_v, max_v, scale, zp = pl.pallas_call(
        kernel,
        out_shape=(jax.ShapeDtypeStruct((C, 1), jnp.float32),
                   jax.ShapeDtypeStruct((C, 1), jnp.float32),
                   jax.ShapeDtypeStruct((C, 1), jnp.float32),
                   jax.ShapeDtypeStruct((C, 1), jnp.int32)),
        grid_spec=pltpu.PrefetchScalarGridSpec(
            num_scalar_prefetch=0,
            grid=(n_cblk, N // nb, n_lane),
            in_specs=[pl.BlockSpec((nb, cb, lane_tile), lambda i, n, j: (n, i, j)),
                      ch_spec, ch_spec],
            out_specs=[ch_spec, ch_spec, ch_spec, ch_spec],
            scratch_shapes=[pltpu.VMEM((cb, strip_w), acc_dtype),
                            pltpu.VMEM((cb, strip_w), acc_dtype)],
        ),
        compiler_params=pltpu.CompilerParams(
            dimension_semantics=("parallel", "arbitrary", "arbitrary"),
            vmem_limit_bytes=32 * 1024 * 1024,      # safe on v7x's 64 MiB VMEM too
        ),
        cost_estimate=pl.CostEstimate(
            flops=2 * N * C * L,
            transcendentals=0,
            bytes_accessed=N * C * L * itemsize + 6 * C * 4,
        ),
    )(x3d, prev_min2d, prev_max2d)

    # forward() returns the original input unchanged.
    return (x_nchw,
            min_v.reshape(C), max_v.reshape(C),
            scale.reshape(C), zp.reshape(C))


# ----------------------------------------------------------------------------
# Pure-JAX reference
# ----------------------------------------------------------------------------
def _reference(x_nchw, prev_min, prev_max):
    C = x_nchw.shape[1]
    x2d = jnp.transpose(x_nchw, (1, 0, 2, 3)).reshape(C, -1).astype(jnp.float32)
    mn = jnp.minimum(prev_min.astype(jnp.float32), jnp.min(x2d, axis=-1))
    mx = jnp.maximum(prev_max.astype(jnp.float32), jnp.max(x2d, axis=-1))
    mn0 = jnp.minimum(mn, 0.0)
    mx0 = jnp.maximum(mx, 0.0)
    scale = jnp.maximum((mx0 - mn0) / (QMAX - QMIN), EPS)
    zp = jnp.clip(QMIN - jnp.round(mn0 / scale), QMIN, QMAX).astype(jnp.int32)
    return mn, mx, scale, zp


if __name__ == "__main__":
    key = jax.random.PRNGKey(0)
    N, C, H, W = 2, 4, 16, 16
    x = jax.random.normal(key, (N, C, H, W), dtype=jnp.float32) * 3.0 + 0.5

    # Fresh observer state (no prior observations).
    prev_min = jnp.full((C,), jnp.inf, dtype=jnp.float32)
    prev_max = jnp.full((C,), -jnp.inf, dtype=jnp.float32)

    x_out, min_v, max_v, scale, zp = affine_observer_forward(x, prev_min, prev_max)
    jax.block_until_ready((x_out, min_v, max_v, scale, zp))

    r_min, r_max, r_scale, r_zp = _reference(x, prev_min, prev_max)
    assert jnp.allclose(x_out, x), "forward must return input unchanged"
    assert jnp.allclose(min_v, r_min, atol=1e-6), (min_v, r_min)
    assert jnp.allclose(max_v, r_max, atol=1e-6), (max_v, r_max)
    assert jnp.allclose(scale, r_scale, atol=1e-6), (scale, r_scale)
    assert jnp.all(zp == r_zp), (zp, r_zp)

    print("KERNEL_OK")
</pallas_src>

<mosaic_0001>
module attributes {stable_mosaic.version = 11 : i64} {
  func.func @kernel(%arg0: i32, %arg1: i32, %arg2: i32, %arg3: memref<2x4x256xf32, #tpu.memory_space<vmem>>, %arg4: memref<4x1xf32, #tpu.memory_space<vmem>>, %arg5: memref<4x1xf32, #tpu.memory_space<vmem>>, %arg6: memref<4x1xf32, #tpu.memory_space<vmem>>, %arg7: memref<4x1xf32, #tpu.memory_space<vmem>>, %arg8: memref<4x1xf32, #tpu.memory_space<vmem>>, %arg9: memref<4x1xi32, #tpu.memory_space<vmem>>, %arg10: memref<4x256xf32, #tpu.memory_space<vmem>>, %arg11: memref<4x256xf32, #tpu.memory_space<vmem>>) attributes {dimension_semantics = [#tpu.dimension_semantics<parallel>, #tpu.dimension_semantics<arbitrary>, #tpu.dimension_semantics<arbitrary>], iteration_bounds = array<i64: 1, 1, 1>, scalar_prefetch = 0 : i64, scratch_operands = 2 : i64, tpu.core_type = #tpu.core_type<tc>, window_params = [{transform_indices = @transform_0, window_bounds = array<i64: 2, 4, 256>}, {transform_indices = @transform_1, window_bounds = array<i64: 4, 1>}, {transform_indices = @transform_2, window_bounds = array<i64: 4, 1>}, {transform_indices = @transform_3, window_bounds = array<i64: 4, 1>}, {transform_indices = @transform_4, window_bounds = array<i64: 4, 1>}, {transform_indices = @transform_5, window_bounds = array<i64: 4, 1>}, {transform_indices = @transform_6, window_bounds = array<i64: 4, 1>}]} {
    %c0_i32 = arith.constant 0 : i32
    %0 = arith.cmpi eq, %arg1, %c0_i32 : i32
    %c0_i32_0 = arith.constant 0 : i32
    %1 = arith.cmpi eq, %arg2, %c0_i32_0 : i32
    %2 = arith.andi %0, %1 : i1
    %c0_i32_1 = arith.constant 0 : i32
    %3 = arith.cmpi eq, %arg1, %c0_i32_1 : i32
    %c0_i32_2 = arith.constant 0 : i32
    %4 = arith.cmpi eq, %arg2, %c0_i32_2 : i32
    %5 = arith.andi %3, %4 : i1
    %cst = arith.constant 0x7F800000 : f32
    %6 = vector.broadcast %cst : f32 to vector<4x256xf32>
    %cst_3 = arith.constant 0xFF800000 : f32
    %7 = vector.broadcast %cst_3 : f32 to vector<4x256xf32>
    %c0_i32_4 = arith.constant 0 : i32
    %c0 = arith.constant 0 : index
    %c0_5 = arith.constant 0 : index
    %c0_6 = arith.constant 0 : index
    %8 = vector.load %arg3[%c0, %c0_5, %c0_6] : memref<2x4x256xf32, #tpu.memory_space<vmem>>, vector<1x4x256xf32>
    %9 = vector.shape_cast %8 : vector<1x4x256xf32> to vector<4x256xf32>
    %10 = arith.minimumf %6, %9 : vector<4x256xf32>
    %11 = arith.maximumf %7, %9 : vector<4x256xf32>
    %c0_i32_7 = arith.constant 0 : i32
    %c1 = arith.constant 1 : index
    %c0_8 = arith.constant 0 : index
    %c0_9 = arith.constant 0 : index
    %12 = vector.load %arg3[%c1, %c0_8, %c0_9] : memref<2x4x256xf32, #tpu.memory_space<vmem>>, vector<1x4x256xf32>
    %13 = vector.shape_cast %12 : vector<1x4x256xf32> to vector<4x256xf32>
    %14 = arith.minimumf %10, %13 : vector<4x256xf32>
    %15 = arith.maximumf %11, %13 : vector<4x256xf32>
    %16 = arith.extui %2 : i1 to i32
    %c0_i32_10 = arith.constant 0 : i32
    %17 = arith.cmpi ne, %16, %c0_i32_10 : i32
    scf.if %17 {
      %c0_13 = arith.constant 0 : index
      %c0_14 = arith.constant 0 : index
      %23 = vector.load %arg10[%c0_13, %c0_14] : memref<4x256xf32, #tpu.memory_space<vmem>>, vector<4x256xf32>
      tpu.vector_store %arg10[%c0_13, %c0_14], %14 {strides = array<i32>} : memref<4x256xf32, #tpu.memory_space<vmem>>, vector<4x256xf32>,
      %c0_15 = arith.constant 0 : index
      %c0_16 = arith.constant 0 : index
      %24 = vector.load %arg11[%c0_15, %c0_16] : memref<4x256xf32, #tpu.memory_space<vmem>>, vector<4x256xf32>
      tpu.vector_store %arg11[%c0_15, %c0_16], %15 {strides = array<i32>} : memref<4x256xf32, #tpu.memory_space<vmem>>, vector<4x256xf32>,
    } else {
    }
    %true = arith.constant true
    %18 = arith.xori %2, %true : i1
    %19 = arith.extui %18 : i1 to i32
    %c0_i32_11 = arith.constant 0 : i32
    %20 = arith.cmpi ne, %19, %c0_i32_11 : i32
    scf.if %20 {
      %c0_13 = arith.constant 0 : index
      %c0_14 = arith.constant 0 : index
      %23 = vector.load %arg10[%c0_13, %c0_14] : memref<4x256xf32, #tpu.memory_space<vmem>>, vector<4x256xf32>
      %24 = arith.minimumf %23, %14 : vector<4x256xf32>
      %c0_15 = arith.constant 0 : index
      %c0_16 = arith.constant 0 : index
      %25 = vector.load %arg10[%c0_15, %c0_16] : memref<4x256xf32, #tpu.memory_space<vmem>>, vector<4x256xf32>
      tpu.vector_store %arg10[%c0_15, %c0_16], %24 {strides = array<i32>} : memref<4x256xf32, #tpu.memory_space<vmem>>, vector<4x256xf32>,
      %c0_17 = arith.constant 0 : index
      %c0_18 = arith.constant 0 : index
      %26 = vector.load %arg11[%c0_17, %c0_18] : memref<4x256xf32, #tpu.memory_space<vmem>>, vector<4x256xf32>
      %27 = arith.maximumf %26, %15 : vector<4x256xf32>
      %c0_19 = arith.constant 0 : index
      %c0_20 = arith.constant 0 : index
      %28 = vector.load %arg11[%c0_19, %c0_20] : memref<4x256xf32, #tpu.memory_space<vmem>>, vector<4x256xf32>
      tpu.vector_store %arg11[%c0_19, %c0_20], %27 {strides = array<i32>} : memref<4x256xf32, #tpu.memory_space<vmem>>, vector<4x256xf32>,
    } else {
    }
    %21 = arith.extui %5 : i1 to i32
    %c0_i32_12 = arith.constant 0 : i32
    %22 = arith.cmpi ne, %21, %c0_i32_12 : i32
    scf.if %22 {
      %c0_13 = arith.constant 0 : index
      %c0_14 = arith.constant 0 : index
      %23 = vector.load %arg10[%c0_13, %c0_14] : memref<4x256xf32, #tpu.memory_space<vmem>>, vector<4x256xf32>
      %cst_15 = arith.constant dense<0x7F800000> : vector<4xf32>
      %24 = vector.multi_reduction <minimumf>, %23, %cst_15 [1] : vector<4x256xf32> to vector<4xf32>
      %25 = vector.shape_cast %24 : vector<4xf32> to vector<4x1xf32>
      %c0_16 = arith.constant 0 : index
      %c0_17 = arith.constant 0 : index
      %26 = vector.load %arg11[%c0_16, %c0_17] : memref<4x256xf32, #tpu.memory_space<vmem>>, vector<4x256xf32>
      %cst_18 = arith.constant dense<0xFF800000> : vector<4xf32>
      %27 = vector.multi_reduction <maximumf>, %26, %cst_18 [1] : vector<4x256xf32> to vector<4xf32>
      %28 = vector.shape_cast %27 : vector<4xf32> to vector<4x1xf32>
      %c0_19 = arith.constant 0 : index
      %c0_20 = arith.constant 0 : index
      %29 = vector.load %arg4[%c0_19, %c0_20] : memref<4x1xf32, #tpu.memory_space<vmem>>, vector<4x1xf32>
      %30 = arith.minimumf %25, %29 : vector<4x1xf32>
      %c0_21 = arith.constant 0 : index
      %c0_22 = arith.constant 0 : index
      %31 = vector.load %arg5[%c0_21, %c0_22] : memref<4x1xf32, #tpu.memory_space<vmem>>, vector<4x1xf32>
      %32 = arith.maximumf %28, %31 : vector<4x1xf32>
      %c0_23 = arith.constant 0 : index
      %c0_24 = arith.constant 0 : index
      %33 = vector.load %arg6[%c0_23, %c0_24] : memref<4x1xf32, #tpu.memory_space<vmem>>, vector<4x1xf32>
      tpu.vector_store %arg6[%c0_23, %c0_24], %30 {strides = array<i32>} : memref<4x1xf32, #tpu.memory_space<vmem>>, vector<4x1xf32>,
      %c0_25 = arith.constant 0 : index
      %c0_26 = arith.constant 0 : index
      %34 = vector.load %arg7[%c0_25, %c0_26] : memref<4x1xf32, #tpu.memory_space<vmem>>, vector<4x1xf32>
      tpu.vector_store %arg7[%c0_25, %c0_26], %32 {strides = array<i32>} : memref<4x1xf32, #tpu.memory_space<vmem>>, vector<4x1xf32>,
      %cst_27 = arith.constant 0.000000e+00 : f32
      %35 = vector.broadcast %cst_27 : f32 to vector<4x1xf32>
      %36 = arith.minimumf %30, %35 : vector<4x1xf32>
      %cst_28 = arith.constant 0.000000e+00 : f32
      %37 = vector.broadcast %cst_28 : f32 to vector<4x1xf32>
      %38 = arith.maximumf %32, %37 : vector<4x1xf32>
      %39 = arith.subf %38, %36 : vector<4x1xf32>
      %cst_29 = arith.constant 2.550000e+02 : f32
      %40 = vector.broadcast %cst_29 : f32 to vector<4x1xf32>
      %41 = arith.divf %39, %40 : vector<4x1xf32>
      %cst_30 = arith.constant 1.1920929E-7 : f32
      %42 = vector.broadcast %cst_30 : f32 to vector<4x1xf32>
      %43 = arith.maximumf %41, %42 : vector<4x1xf32>
      %44 = arith.divf %36, %43 : vector<4x1xf32>
      %45 = math.roundeven %44 : vector<4x1xf32>
      %cst_31 = arith.constant -1.280000e+02 : f32
      %46 = vector.broadcast %cst_31 : f32 to vector<4x1xf32>
      %47 = arith.subf %46, %45 : vector<4x1xf32>
      %cst_32 = arith.constant -1.280000e+02 : f32
      %cst_33 = arith.constant 1.270000e+02 : f32
      %48 = vector.broadcast %cst_32 : f32 to vector<4x1xf32>
      %49 = arith.maximumf %48, %47 : vector<4x1xf32>
      %50 = vector.broadcast %cst_33 : f32 to vector<4x1xf32>
      %51 = arith.minimumf %50, %49 : vector<4x1xf32>
      %c0_34 = arith.constant 0 : index
      %c0_35 = arith.constant 0 : index
      %52 = vector.load %arg8[%c0_34, %c0_35] : memref<4x1xf32, #tpu.memory_space<vmem>>, vector<4x1xf32>
      tpu.vector_store %arg8[%c0_34, %c0_35], %43 {strides = array<i32>} : memref<4x1xf32, #tpu.memory_space<vmem>>, vector<4x1xf32>,
      %53 = arith.fptosi %51 : vector<4x1xf32> to vector<4x1xi32>
      %c0_36 = arith.constant 0 : index
      %c0_37 = arith.constant 0 : index
      %54 = vector.load %arg9[%c0_36, %c0_37] : memref<4x1xi32, #tpu.memory_space<vmem>>, vector<4x1xi32>
      tpu.vector_store %arg9[%c0_36, %c0_37], %53 {strides = array<i32>} : memref<4x1xi32, #tpu.memory_space<vmem>>, vector<4x1xi32>,
    } else {
    }
    return
  }
  func.func @transform_0(%arg0: i32, %arg1: i32, %arg2: i32) -> (i32, i32, i32) {
    %c0_i32 = arith.constant 0 : i32
    return %arg1, %arg0, %arg2 : i32, i32, i32
  }
  func.func @transform_1(%arg0: i32, %arg1: i32, %arg2: i32) -> (i32, i32) {
    %c0_i32 = arith.constant 0 : i32
    %c0_i32_0 = arith.constant 0 : i32
    return %arg0, %c0_i32 : i32, i32
  }
  func.func @transform_2(%arg0: i32, %arg1: i32, %arg2: i32) -> (i32, i32) {
    %c0_i32 = arith.constant 0 : i32
    %c0_i32_0 = arith.constant 0 : i32
    return %arg0, %c0_i32 : i32, i32
  }
  func.func @transform_3(%arg0: i32, %arg1: i32, %arg2: i32) -> (i32, i32) {
    %c0_i32 = arith.constant 0 : i32
    %c0_i32_0 = arith.constant 0 : i32
    return %arg0, %c0_i32 : i32, i32
  }
  func.func @transform_4(%arg0: i32, %arg1: i32, %arg2: i32) -> (i32, i32) {
    %c0_i32 = arith.constant 0 : i32
    %c0_i32_0 = arith.constant 0 : i32
    return %arg0, %c0_i32 : i32, i32
  }
  func.func @transform_5(%arg0: i32, %arg1: i32, %arg2: i32) -> (i32, i32) {
    %c0_i32 = arith.constant 0 : i32
    %c0_i32_0 = arith.constant 0 : i32
    return %arg0, %c0_i32 : i32, i32
  }
  func.func @transform_6(%arg0: i32, %arg1: i32, %arg2: i32) -> (i32, i32) {
    %c0_i32 = arith.constant 0 : i32
    %c0_i32_0 = arith.constant 0 : i32
    return %arg0, %c0_i32 : i32, i32
  }
}

</mosaic_0001>

<bundles_post_ra>
// kernel: tpu_custom_call.1
= control target key start
LH: loop header
LB: loop body
LE: loop exit
PB: predicated region body
PF: predicated region fallthrough
CT: control target
= control target key end

     0   :  { %12 = vsyncpa [#allocation5], 0  ;;  %s186_s24 = smov [#allocation4]   ;;  %s187_s26 = smov 128   ;;  %s250_s0 = inlined_call_operand.hbm [shape: f32[2,4,256], index: 0, kind: input, shape index: {}]   ;;  %s251_s1 = inlined_call_operand.vmem [shape: f32[4,1], index: 1, kind: input, shape index: {}]   ;;  %s252_s2 = inlined_call_operand.vmem [shape: f32[4,1], index: 2, kind: input, shape index: {}]   ;;  %s253_s3 = inlined_call_operand.vmem [shape: f32[4,1], index: 3, kind: output, shape index: {0}]   ;;  %s254_s4 = inlined_call_operand.vmem [shape: f32[4,1], index: 4, kind: output, shape index: {1}]   ;;  %s255_s5 = inlined_call_operand.vmem [shape: f32[4,1], index: 5, kind: output, shape index: {2}]   ;;  %s256_s6 = inlined_call_operand.vmem [shape: s32[4,1], index: 6, kind: output, shape index: {3}]  }
   0x1   :  { %s17_s23 = sshll.u32 %s250_s0, 4  ;;  %s19_s25 = sshll.u32 %s186_s24, 4  ;;  %s18_s23 = int_to_ptr.hbm [resolvable:$true] %s17_s23  ;;  %s20_s25 = int_to_ptr.vmem [resolvable:$true] %s19_s25 }
   0x2   :  { %s188_s27 = smov 8  }
   0x3   :  { %25 = dma.hbm_to_vmem [thread:$0]  %s18_s23, 256, %s20_s25, [#allocation5], %s187_s26, %s187_s26, %s188_s27  }
   0x4   :  { %184 = dma.done.wait [#allocation5], 256  }
   0x5   :  { %185 = vsyncadd [#allocation5], 4294967040  ;;  %v38_v0 = vld [vmem:[#allocation4] sm:$0xff]  ;;  %v40_v1 = vld [vmem:[#allocation4 + $0x8] sm:$0xff]  ;;  %vm54_vm0 = vcmask 1043456   ;;  %v189_v14 = vmov 255.0  }
   0x6   :  { %v41_v2 = vmin.f32 %v38_v0, %v40_v1  ;;  %v42_v3 = vmax.f32 %v38_v0, %v40_v1  ;;  %156 = vrcp.f32 %v189_v14  ;;  %v72_v17 = vld [vmem:[%s251_s1] sm:$0xf]  ;;  %vm76_vm1 = vcmask 3072  }
   0x7   :  { %v74_v22 = vld [vmem:[%s252_s2] sm:$0xf] }
   0x8   :  { %49 = vst [vmem:[#allocation1] ss:$2 sm:$0xff] %v41_v2 }
   0xc   :  { %v157_v15 = vpop.eup %156 }
   0xd   :  { %v83_v16 = vmul.f32 255.0, %v157_v15  ;;  %vm87_vm2 = vweird.f32 %v157_v15 }
   0xf   :  { %v50_v4 = vld.sshfl [vmem:[#allocation1] sm:$0xff pattern:$0x75316420]  ;;  %v51_v5 = vld.sshfl [vmem:[#allocation1 + $0x8] sm:$0xff pattern:$0x75316420] }
  0x10   :  { %v55_v6 = vsel %vm54_vm0, %v50_v4, inf  ;;  %v56_v7 = vsel %vm54_vm0, %v51_v5, inf  ;;  %62 = vst [vmem:[#allocation1] ss:$2 sm:$0xff] %v42_v3  ;;  %v84_v19 = vsub.f32 1.0, %v83_v16 }
  0x11   :  { %v57_v8 = vmin.f32 %v55_v6, %v56_v7 }
  0x12   :  { %v85_v21 = vmul.f32 %v157_v15, %v84_v19 }
  0x13   :  { %58 = vmin.xlane.f32.xlu0 %v57_v8 }
  0x14   :  { %v86_v23 = vadd.f32 %v157_v15, %v85_v21 }
  0x16   :  { %v88_v28 = vsel %vm87_vm2, %v157_v15, %v86_v23 }
  0x17   :  { %v63_v9 = vld.sshfl [vmem:[#allocation1] sm:$0xff pattern:$0x75316420]  ;;  %v64_v10 = vld.sshfl [vmem:[#allocation1 + $0x8] sm:$0xff pattern:$0x75316420] }
  0x18   :  { %v67_v11 = vsel %vm54_vm0, %v63_v9, -inf  ;;  %v68_v12 = vsel %vm54_vm0, %v64_v10, -inf }
  0x19   :  { %v69_v13 = vmax.f32 %v67_v11, %v68_v12 }
  0x1b   :  { %70 = vmax.xlane.f32.xlu0 %v69_v13 }
  0x86   :  { %v59_v18 = vpop.xlane.xlu0 %58 }
  0x87   :  { %v73_v20 = vmin.f32 %v59_v18, %v72_v17 }
  0x89   :  { %77 = vst.msk [vmem:[%s253_s3] sm:$0xf] %vm76_vm1, %v73_v20  ;;  %v79_v26 = vmin.f32 %v73_v20, 0.0 }
  0x8e   :  { %v71_v24 = vpop.xlane.xlu0 %70 }
  0x8f   :  { %v75_v25 = vmax.f32 %v71_v24, %v74_v22 }
  0x91   :  { %78 = vst.msk [vmem:[%s254_s4] sm:$0xf] %vm76_vm1, %v75_v25  ;;  %v80_v27 = vmax.f32 %v75_v25, 0.0 }
  0x93   :  { %v81_v29 = vsub.f32 %v80_v27, %v79_v26 }
  0x95   :  { %v89_v30 = vmul.f32 %v88_v28, %v81_v29 }
  0x97   :  { %v90_v31 = vmax.f32 %v89_v30, 1.1920929e-07 }
  0x99   :  { %158 = vrcp.f32 %v90_v31  ;;  %110 = vst.msk [vmem:[%s255_s5] sm:$0xf] %vm76_vm1, %v90_v31  ;;  %v102_v35 = vand.u32 2147483648, %v90_v31  ;;  %v100_v37 = vand.u32 2147483647, %v90_v31  ;;  %vm96_vm4 = vweird.f32 %v90_v31 }
  0x9b   :  { %v103_v39 = vor.u32 1.1754944e-38, %v102_v35  ;;  %vm101_vm6 = vcmp.eq.f32.partialorder %v100_v37, 8.507059e+37 }
  0x9f   :  { %v159_v32 = vpop.eup %158 }
  0xa0   :  { %v92_v33 = vmul.f32 %v159_v32, %v90_v31  ;;  %vm97_vm3 = vweird.f32 %v159_v32 }
  0xa1   :  { %vm98_vm5 = vmor %vm96_vm4, %vm97_vm3 }
  0xa2   :  { %v93_v34 = vsub.f32 1.0, %v92_v33 }
  0xa4   :  { %v94_v36 = vmul.f32 %v159_v32, %v93_v34 }
  0xa6   :  { %v95_v38 = vadd.f32 %v159_v32, %v94_v36 }
  0xa8   :  { %v99_v40 = vsel %vm98_vm5, %v159_v32, %v95_v38 }
  0xa9   :  { %v104_v41 = vsel %vm101_vm6, %v103_v39, %v99_v40 }
  0xaa   :  { %v105_v42 = vmul.f32 %v104_v41, %v79_v26 }
  0xac   :  { %v141_v43 = vcvt.f32.s32 %v105_v42  ;;  %v139_v45 = vand.u32 2147483647, %v105_v42  ;;  %v144_v47 = vand.u32 2147483648, %v105_v42 }
  0xae   :  { %v142_v44 = vcvt.s32.f32 %v141_v43  ;;  %vm140_vm7 = vcmp.lt.f32.partialorder %v139_v45, 8388608.0 }
  0xb0   :  { %v143_v46 = vand.u32 2147483647, %v142_v44 }
  0xb2   :  { %v145_v48 = vor.u32 %v144_v47, %v143_v46 }
  0xb4   :  { %v146_v49 = vsel %vm140_vm7, %v145_v48, %v105_v42 }
  0xb5   :  { %v107_v50 = vsub.f32 -128.0, %v146_v49 }
  0xb7   :  { %v108_v51 = vmax.f32 %v107_v50, -128.0 }
  0xb9   :  { %v109_v52 = vmin.f32 %v108_v51, 127.0 }
  0xbb   :  { %vm147_vm8 = vcmp.lt.s32.totalorder %v109_v52, 0  ;;  %v148_v53 = vceil.f32 %v109_v52  ;;  %v149_v54 = vfloor.f32 %v109_v52 }
  0xbd   :  { %v150_v55 = vsel %vm147_vm8, %v148_v53, %v149_v54 }
  0xbe   :  { %v151_v56 = vcvt.f32.s32 %v150_v55 }
  0xc0   :  { %112 = vst.msk [vmem:[%s256_s6] sm:$0xf] %vm76_vm1, %v151_v56 }
  0xc1   :  { %138 = vsyncpa [#allocation5], 1 }

</bundles_post_ra>
